<compile_context>
chip_gen: v7x
topology: tpu7x:2x2x1
jax: 0.10.0
libtpu: 0.0.40
codegen_flags: <defaults>
</compile_context>

<pallas_src>
import functools

import jax
import jax.numpy as jnp
from jax.experimental import pallas as pl
from jax.experimental.pallas import tpu as pltpu


# ----------------------------- Pallas kernel ------------------------------

def noobj_conf_kernel(zc_ref, noobj_ref, out_ref):
    """Dense no-object confidence loss.

    zc_ref    : (br, 128) conf logits (flattened (b, a, j, i) cells, padded)
    noobj_ref : (br, 128) noobj mask in {0, 1} (0 on padding)
    out_ref   : (1, 8, 128) per-outer-block accumulator, kept resident across
                the inner ("arbitrary") grid axis.
    """
    t = pl.program_id(1)

    @pl.when(t == 0)
    def _init():
        out_ref[...] = jnp.zeros_like(out_ref)

    z = zc_ref[...]
    # BCE(sigmoid(z), target=0) with torch's BCELoss log-clamp at -100:
    #   min(softplus(z), 100).  2 EUP ops per element (exp + log1p).
    sp = jnp.maximum(z, 0.0) + jnp.log1p(jnp.exp(-jnp.abs(z)))
    loss = noobj_ref[...] * jnp.minimum(sp, 100.0)          # (br, 128)

    # Sublane-group reduce (pure VPU vreg adds, tile-aligned reshape) down to
    # one (8, 128) slab; lane-dense accumulate into the tiny output block.
    out_ref[...] += jnp.sum(loss.reshape(-1, 8, 128), axis=0)[None]


# ----------------------------- JAX glue ------------------------------------

def _round_up(x, m):
    return ((x + m - 1) // m) * m


def _build_noobj_and_sparse_loss(output, target, scaled_anchors,
                                 nB, nA, nC, nH, nW, Np, ignore_thres):
    """Returns (noobj_map of shape (Np,), sparse obj-cell loss scalar)."""
    D = 5 + nC
    N = nB * nA * nH * nW
    nT = target.shape[0]

    tb = target[:, 0].astype(jnp.int32)
    tlabel = target[:, 1].astype(jnp.int32)
    gx = target[:, 2] * nW
    gy = target[:, 3] * nH
    gw = target[:, 4] * nW
    gh = target[:, 5] * nH

    # wh-IoU of every anchor against every gt box: (nA, nT)
    aw = scaled_anchors[:, 0:1]
    ah = scaled_anchors[:, 1:2]
    inter = jnp.minimum(aw, gw[None, :]) * jnp.minimum(ah, gh[None, :])
    union = aw * ah + 1e-16 + gw[None, :] * gh[None, :] - inter
    ious = inter / union
    best_n = jnp.argmax(ious, axis=0)                       # (nT,)

    # Clamp grid indices so edge boxes stay in range (flattened scatter).
    gi = jnp.clip(jnp.floor(gx).astype(jnp.int32), 0, nW - 1)
    gj = jnp.clip(jnp.floor(gy).astype(jnp.int32), 0, nH - 1)

    # ---- dense noobj mask (the ONLY dense target map still needed) --------
    noobj = jnp.pad(jnp.ones((N,), jnp.float32), (0, Np - N))   # pad rows = 0
    aidx = jnp.arange(nA)
    idx_all = ((tb[:, None] * nA + aidx[None, :]) * nH + gj[:, None]) * nW \
              + gi[:, None]                                   # (nT, nA)
    keep = jnp.where(ious.T > ignore_thres, 0.0, 1.0)         # ignore-thresh
    keep = keep * (1.0 - jax.nn.one_hot(best_n, nA, dtype=jnp.float32))
    noobj = noobj.at[idx_all].min(keep)                       # single scatter

    # ---- sparse obj-cell losses (nT cells, plain JAX) ----------------------
    idx_best = ((tb * nA + best_n) * nH + gj) * nW + gi       # (nT,)

    # Dedup weight: torch scatter semantics (each cell counted once, the LAST
    # target writing a cell supplies its values) -> keep only the last
    # occurrence of each idx_best.
    t_ar = jnp.arange(nT)
    later_dup = (idx_best[None, :] == idx_best[:, None]) & \
                (t_ar[None, :] > t_ar[:, None])
    wgt = 1.0 - jnp.any(later_dup, axis=1).astype(jnp.float32)

    # Gather the D prediction channels at each best cell directly from the
    # raw NCHW output (only nT*D elements; no full transpose of predictions).
    c = jnp.arange(D)
    flat_idx = ((((tb * nA + best_n)[:, None] * D + c[None, :]) * nH
                 + gj[:, None]) * nW + gi[:, None])           # (nT, D)
    pred_t = output.reshape(-1)[flat_idx]                     # (nT, D)

    tx = gx - jnp.floor(gx)
    ty = gy - jnp.floor(gy)
    tw = jnp.log(gw / scaled_anchors[best_n, 0] + 1e-16)
    th = jnp.log(gh / scaled_anchors[best_n, 1] + 1e-16)
    tcls = jax.nn.one_hot(tlabel, nC, dtype=jnp.float32)      # (nT, nC)

    def bce_logits(z, t01):
        # == torch.sigmoid(z) followed by BCELoss (log-clamped at -100).
        sp = jnp.maximum(z, 0.0) + jnp.log1p(jnp.exp(-jnp.abs(z)))
        return t01 * jnp.minimum(sp - z, 100.0) \
            + (1.0 - t01) * jnp.minimum(sp, 100.0)

    sx = jax.nn.sigmoid(pred_t[:, 0])
    sy = jax.nn.sigmoid(pred_t[:, 1])
    mse = ((sx - tx) ** 2 + (sy - ty) ** 2
           + (pred_t[:, 2] - tw) ** 2 + (pred_t[:, 3] - th) ** 2)
    conf_obj = bce_logits(pred_t[:, 4], 1.0)                  # obj conf BCE
    cls_bce = jnp.sum(bce_logits(pred_t[:, 5:], tcls), axis=1)

    sparse_loss = jnp.sum(wgt * (mse + conf_obj + cls_bce))
    return noobj, sparse_loss


def yolov3_loss(output, target, anchors, *, num_classes=2, num_anchors=3,
                stride=32, thresh=0.5, block_rows=1024):
    """output: (nB, nA*(5+nC), nH, nW) float32 (NCHW, as in PyTorch).
       target: (nT, 6) float32 rows [batch, label, cx, cy, w, h] (normalized).
       Returns scalar total_loss / nB (same as Yolov3LossNew.forward)."""
    nB, _, nH, nW = output.shape
    nA = num_anchors
    nC = num_classes
    D = 5 + nC
    N = nB * nA * nH * nW

    # ---- tiling: N cells -> (Nr, 128) sublane/lane dense ------------------
    # Dense kernel only touches 2 channels, so even 1024-row blocks are only
    # ~2 MiB double-buffered (safe on v5e's 16 MiB scoped default and far
    # under v6e/v7x limits) while amortizing the ~0.35 us per-step overhead.
    nr_raw = -(-N // 128)
    br = _round_up(min(block_rows, _round_up(nr_raw, 8)), 8)
    num_blocks = -(-nr_raw // br)
    if num_blocks >= 2 and num_blocks % 2:
        num_blocks += 1          # even block count -> 2-way megacore on v7x
    Nr = num_blocks * br
    Np = Nr * 128
    g_outer = 2 if num_blocks >= 2 else 1
    g_inner = num_blocks // g_outer

    scaled_anchors = jnp.asarray(anchors, jnp.float32) / float(stride)

    noobj, sparse_loss = _build_noobj_and_sparse_loss(
        output, target, scaled_anchors, nB, nA, nC, nH, nW, Np, thresh)

    # Only the conf-logit channel goes through the dense kernel (1/7th of the
    # old channel-major copy); the zero padding is killed by noobj == 0.
    zconf = output.reshape(nB, nA, D, nH * nW)[:, :, 4, :].reshape(N)
    zconf = jnp.pad(zconf, (0, Np - N)).reshape(Nr, 128).astype(jnp.float32)
    noobj = noobj.reshape(Nr, 128)

    partials = pl.pallas_call(
        noobj_conf_kernel,
        out_shape=jax.ShapeDtypeStruct((g_outer, 8, 128), jnp.float32),
        grid=(g_outer, g_inner),
        in_specs=[
            pl.BlockSpec((br, 128), lambda p, t, _gi=g_inner: (p * _gi + t, 0)),
            pl.BlockSpec((br, 128), lambda p, t, _gi=g_inner: (p * _gi + t, 0)),
        ],
        out_specs=pl.BlockSpec((1, 8, 128), lambda p, t: (p, 0, 0)),
        compiler_params=pltpu.CompilerParams(
            dimension_semantics=("parallel", "arbitrary")),
    )(zconf, noobj)

    loss_conf_noobj = jnp.sum(partials)          # tiny (g_outer*8*128) reduce
    total = sparse_loss + 0.5 * loss_conf_noobj

    # TODO(synk): metrics dict (iou_scores / class_mask / precision / recall /
    # cls_acc / conf stats) requires host-side .item() bookkeeping; not part
    # of the returned loss.
    return total / nB


# ------------------------------- main ---------------------------------------

if __name__ == "__main__":
    num_classes = 2
    num_anchors = 3
    stride = 32
    anchors = jnp.asarray([(116.0, 90.0), (156.0, 198.0), (373.0, 326.0)],
                          dtype=jnp.float32)

    nB, nH, nW = 2, 8, 8
    nT = 5
    C = num_anchors * (5 + num_classes)  # 21

    key = jax.random.PRNGKey(0)
    k_out, k_b, k_l, k_c = jax.random.split(key, 4)

    output = jax.random.normal(k_out, (nB, C, nH, nW), dtype=jnp.float32)
    t_b = jax.random.randint(k_b, (nT,), 0, nB).astype(jnp.float32)
    t_lab = jax.random.randint(k_l, (nT,), 0, num_classes).astype(jnp.float32)
    t_box = jax.random.uniform(k_c, (nT, 4), minval=0.1, maxval=0.9,
                               dtype=jnp.float32)
    target = jnp.concatenate([t_b[:, None], t_lab[:, None], t_box], axis=1)

    loss_fn = jax.jit(functools.partial(
        yolov3_loss, num_classes=num_classes, num_anchors=num_anchors,
        stride=stride, thresh=0.5))

    loss = loss_fn(output, target, anchors)
    loss = jax.block_until_ready(loss)
    assert jnp.isfinite(loss), "loss is not finite"
    print("KERNEL_OK")
</pallas_src>

<mosaic_0001>
module attributes {stable_mosaic.version = 11 : i64} {
  func.func @noobj_conf_kernel(%arg0: i32, %arg1: i32, %arg2: memref<8x128xf32, #tpu.memory_space<vmem>>, %arg3: memref<8x128xf32, #tpu.memory_space<vmem>>, %arg4: memref<1x8x128xf32, #tpu.memory_space<vmem>>) attributes {dimension_semantics = [#tpu.dimension_semantics<parallel>, #tpu.dimension_semantics<arbitrary>], iteration_bounds = array<i64: 1, 1>, scalar_prefetch = 0 : i64, scratch_operands = 0 : i64, tpu.core_type = #tpu.core_type<tc>, window_params = [{transform_indices = @transform_0, window_bounds = array<i64: 8, 128>}, {transform_indices = @transform_1, window_bounds = array<i64: 8, 128>}, {transform_indices = @transform_2, window_bounds = array<i64: 1, 8, 128>}]} {
    %c0_i32 = arith.constant 0 : i32
    %0 = arith.cmpi eq, %arg1, %c0_i32 : i32
    %1 = arith.extui %0 : i1 to i32
    %c0_i32_0 = arith.constant 0 : i32
    %2 = arith.cmpi ne, %1, %c0_i32_0 : i32
    scf.if %2 {
      %cst_13 = arith.constant 0.000000e+00 : f32
      %22 = vector.broadcast %cst_13 : f32 to vector<1x8x128xf32>
      %c0_14 = arith.constant 0 : index
      %c0_15 = arith.constant 0 : index
      %c0_16 = arith.constant 0 : index
      %23 = vector.load %arg4[%c0_14, %c0_15, %c0_16] : memref<1x8x128xf32, #tpu.memory_space<vmem>>, vector<1x8x128xf32>
      tpu.vector_store %arg4[%c0_14, %c0_15, %c0_16], %22 {strides = array<i32>} : memref<1x8x128xf32, #tpu.memory_space<vmem>>, vector<1x8x128xf32>,
    } else {
    }
    %c0 = arith.constant 0 : index
    %c0_1 = arith.constant 0 : index
    %3 = vector.load %arg2[%c0, %c0_1] : memref<8x128xf32, #tpu.memory_space<vmem>>, vector<8x128xf32>
    %cst = arith.constant 0.000000e+00 : f32
    %4 = vector.broadcast %cst : f32 to vector<8x128xf32>
    %5 = arith.maximumf %3, %4 : vector<8x128xf32>
    %6 = math.absf %3 : vector<8x128xf32>
    %cst_2 = arith.constant 0.000000e+00 : f32
    %7 = vector.broadcast %cst_2 : f32 to vector<8x128xf32>
    %8 = arith.subf %7, %6 : vector<8x128xf32>
    %9 = math.exp %8 : vector<8x128xf32>
    %10 = math.log1p %9 : vector<8x128xf32>
    %11 = arith.addf %5, %10 : vector<8x128xf32>
    %c0_3 = arith.constant 0 : index
    %c0_4 = arith.constant 0 : index
    %12 = vector.load %arg3[%c0_3, %c0_4] : memref<8x128xf32, #tpu.memory_space<vmem>>, vector<8x128xf32>
    %cst_5 = arith.constant 1.000000e+02 : f32
    %13 = vector.broadcast %cst_5 : f32 to vector<8x128xf32>
    %14 = arith.minimumf %11, %13 : vector<8x128xf32>
    %15 = arith.mulf %12, %14 : vector<8x128xf32>
    %c0_6 = arith.constant 0 : index
    %c0_7 = arith.constant 0 : index
    %c0_8 = arith.constant 0 : index
    %16 = vector.load %arg4[%c0_6, %c0_7, %c0_8] : memref<1x8x128xf32, #tpu.memory_space<vmem>>, vector<1x8x128xf32>
    %17 = vector.shape_cast %15 : vector<8x128xf32> to vector<1x8x128xf32>
    %cst_9 = arith.constant dense<0.000000e+00> : vector<8x128xf32>
    %18 = vector.multi_reduction <add>, %17, %cst_9 [0] : vector<1x8x128xf32> to vector<8x128xf32>
    %19 = vector.shape_cast %18 : vector<8x128xf32> to vector<1x8x128xf32>
    %20 = arith.addf %16, %19 : vector<1x8x128xf32>
    %c0_10 = arith.constant 0 : index
    %c0_11 = arith.constant 0 : index
    %c0_12 = arith.constant 0 : index
    %21 = vector.load %arg4[%c0_10, %c0_11, %c0_12] : memref<1x8x128xf32, #tpu.memory_space<vmem>>, vector<1x8x128xf32>
    tpu.vector_store %arg4[%c0_10, %c0_11, %c0_12], %20 {strides = array<i32>} : memref<1x8x128xf32, #tpu.memory_space<vmem>>, vector<1x8x128xf32>,
    return
  }
  func.func @transform_0(%arg0: i32, %arg1: i32) -> (i32, i32) {
    %c1_i32 = arith.constant 1 : i32
    %0 = arith.muli %arg0, %c1_i32 : i32
    %1 = arith.addi %0, %arg1 : i32
    %c0_i32 = arith.constant 0 : i32
    %c0_i32_0 = arith.constant 0 : i32
    return %1, %c0_i32 : i32, i32
  }
  func.func @transform_1(%arg0: i32, %arg1: i32) -> (i32, i32) {
    %c1_i32 = arith.constant 1 : i32
    %0 = arith.muli %arg0, %c1_i32 : i32
    %1 = arith.addi %0, %arg1 : i32
    %c0_i32 = arith.constant 0 : i32
    %c0_i32_0 = arith.constant 0 : i32
    return %1, %c0_i32 : i32, i32
  }
  func.func @transform_2(%arg0: i32, %arg1: i32) -> (i32, i32, i32) {
    %c0_i32 = arith.constant 0 : i32
    %c0_i32_0 = arith.constant 0 : i32
    %c0_i32_1 = arith.constant 0 : i32
    return %arg0, %c0_i32, %c0_i32_0 : i32, i32, i32
  }
}

</mosaic_0001>

<bundles_post_ra>
// kernel: mul.55
= control target key start
LH: loop header
LB: loop body
LE: loop exit
PB: predicated region body
PF: predicated region fallthrough
CT: control target
= control target key end

     0   :  { %s34_s0 = inlined_call_operand.vmem [shape: f32[5], index: 0, kind: input, shape index: {}]   ;;  %s35_s1 = inlined_call_operand.vmem [shape: f32[5], index: 1, kind: input, shape index: {}]   ;;  %s36_s2 = inlined_call_operand.vmem [shape: f32[5], index: 2, kind: output, shape index: {}]  }
   0x1   :  { %v3_v0 = vld [vmem:[%s34_s0] sm:$0x1] }
   0x2   :  { %v4_v1 = vld [vmem:[%s35_s1] sm:$0x1] }
   0x3   :  { %v7_v2 = vmul.f32 %v4_v1, %v3_v0 }
   0x5   :  { %9 = vst [vmem:[%s36_s2] sm:$0x1] %v7_v2 }

// kernel: squeeze.23
= control target key start
LH: loop header
LB: loop body
LE: loop exit
PB: predicated region body
PF: predicated region fallthrough
CT: control target
= control target key end

     0   :  { %vm12_vm0 = vcmask 523264   ;;  %s33_s10 = smov 64   ;;  %vm23_vm1 = vcmask 1048064   ;;  %s53_s0 = inlined_call_operand.vmem [shape: f32[2,3,1,64], index: 0, kind: input, shape index: {}]   ;;  %s54_s1 = inlined_call_operand.vmem [shape: f32[384], index: 1, kind: output, shape index: {}]  }
   0x1   :  { %v31_v0 = vld [vmem:[%s53_s0 + $0x4] sm:$0xf]  ;;  %v8_v1 = vld [vmem:[%s53_s0] sm:$0xf]  ;;  %s10_s0 = smov 3 }
   0x2   :  { %7 = vst [vmem:[#allocation1 + $0x8] sm:$0xf] %v31_v0  ;;  %9 = vst [vmem:[#allocation1] sm:$0xf] %v8_v1 }
   0x9   :  { %v20_v2 = vld.sshfl [vmem:[#allocation1 + $0x1] sm:$0xff pattern:$0x99999970]   ;;  %v15_v4 = vld [vmem:[#allocation1 + $0x9] sm:$0x1]  }
   0xa   :  { %v11_v3 = vld [vmem:[#allocation1] ss:$2 sm:%s10_s0]   ;;  %21 = vrot.lane.b32.xlu0 %v20_v2, %s33_s10  ;;  %18 = vst.msk [vmem:[#allocation0 + $0x2] sm:$0x1] %vm12_vm0, %v15_v4  }
   0xb   :  { %13 = vst.msk [vmem:[#allocation0] sm:$0x3] %vm12_vm0, %v11_v3  }
  0x7c   :  { %v22_v5 = vpop.permute.xlu0 %21  }
  0x7d   :  { %24 = vst.msk [vmem:[#allocation0] sm:$0x7] %vm23_vm1, %v22_v5  }
  0x84   :  { %v28_v6 = vld [vmem:[#allocation0] sm:$0xf] }
  0x85   :  { %30 = vst [vmem:[%s54_s1] sm:$0xf] %v28_v6 }

// kernel: yolov3_loss.1
= control target key start
LH: loop header
LB: loop body
LE: loop exit
PB: predicated region body
PF: predicated region fallthrough
CT: control target
= control target key end

     0   :  { %s118_s0 = inlined_call_operand.vmem [shape: f32[8,128], index: 0, kind: input, shape index: {}]   ;;  %s119_s1 = inlined_call_operand.vmem [shape: f32[8,128], index: 1, kind: input, shape index: {}]   ;;  %s120_s2 = inlined_call_operand.vmem [shape: f32[1,8,128], index: 2, kind: output, shape index: {}]  }
   0x1   :  { %v50_v0 = vld [vmem:[%s118_s0] sm:$0xff] }
   0x2   :  { %v52_v1 = vand.u32 2147483647, %v50_v0  ;;  %v51_v11 = vmax.f32 %v50_v0, 0.0  ;;  %v66_v15 = vld [vmem:[%s119_s1] sm:$0xff] }
   0x4   :  { %v53_v2 = vsub.f32 0.0, %v52_v1 }
   0x6   :  { %v54_v3 = vmul.f32 1.442695, %v53_v2 }
   0x8   :  { %90 = vpow2.f32 %v54_v3 }
  0x12   :  { %v91_v4 = vpop.eup %90 }
  0x13   :  { %v56_v5 = vadd.f32 1.0, %v91_v4  ;;  %v59_v6 = vmul.f32 -0.5, %v91_v4  ;;  %v62_v8 = vand.u32 2147483647, %v91_v4 }
  0x15   :  { %92 = vlog2.f32 %v56_v5  ;;  %v60_v7 = vadd.f32 1.0, %v59_v6  ;;  %vm63_vm0 = vcmp.lt.f32.partialorder %v62_v8, 0.0004427343 }
  0x17   :  { %v61_v9 = vmul.f32 %v91_v4, %v60_v7 }
  0x1f   :  { %v93_v10 = vpop.eup %92 }
  0x20   :  { %v58_v12 = vmul.f32 0.6931472, %v93_v10 }
  0x22   :  { %v64_v13 = vsel %vm63_vm0, %v61_v9, %v58_v12 }
  0x23   :  { %v65_v14 = vadd.f32 %v64_v13, %v51_v11 }
  0x25   :  { %v67_v16 = vmin.f32 %v65_v14, 100.0 }
  0x27   :  { %v68_v17 = vmul.f32 %v67_v16, %v66_v15 }
  0x29   :  { %72 = vst [vmem:[%s120_s2] sm:$0xff] %v68_v17 }

</bundles_post_ra>
